<compile_context>
chip_gen: v5e
topology: v5e:2x2
jax: 0.10.0
libtpu: 0.0.40
codegen_flags: <defaults>
</compile_context>

<pallas_src>
import jax
import jax.numpy as jnp
from jax.experimental import pallas as pl
from jax.experimental.pallas import tpu as pltpu


def _add_pos_kernel(pos_ref, x_ref, o_ref):
    # pos_ref: (t, hwd)   positional slab, identical for every batch element
    # x_ref/o_ref: (1, t, hwd) slab for batch b
    o_ref[0] = x_ref[0] + pos_ref[...]


def position_embedding_learned_visual(x, time_w, height_w, width_w):
    """x: (B, t, h, w, d); *_w: full embedding tables (max_*, n_embd_*)."""
    B, t, h, w, d = x.shape
    nt = time_w.shape[1]
    nh = height_w.shape[1]
    nw = width_w.shape[1]
    assert nt + nw + nh == d, "embedding split must sum to d"

    # ---- precompute the (t, h, w, d) positional table once (plain JAX) ----
    t_emb = time_w[:t]                                              # (t, nt)
    w_emb = width_w[:w]                                             # (w, nw)
    h_emb = height_w[:h]                                            # (h, nh)
    pos_t = jnp.broadcast_to(t_emb[:, None, None, :], (t, h, w, nt))
    pos_w = jnp.broadcast_to(w_emb[None, None, :, :], (t, h, w, nw))
    pos_h = jnp.broadcast_to(h_emb[None, :, None, :], (t, h, w, nh))
    # NOTE: PyTorch concatenates in the order [time, width, height]
    pos = jnp.concatenate([pos_t, pos_w, pos_h], axis=-1)           # (t,h,w,d)

    # ---- lane-dense flat layout ----
    hwd = h * w * d
    pos_flat = pos.reshape(t, hwd).astype(x.dtype)                  # (t, hwd)
    x_flat = x.reshape(B, t, hwd)                                   # (B, t, hwd)

    # VMEM budget: x/out blocks double-buffered + resident pos slab.
    itemsize = jnp.dtype(x.dtype).itemsize
    block_bytes = t * hwd * itemsize
    vmem_need = 4 * block_bytes + 2 * pos_flat.size * itemsize + (1 << 20)
    # TODO(synk): for very large (t, h, w, d) add an extra grid axis over t so
    # the per-step block stays within ~6-8 MiB on v7x's 64 MiB VMEM.
    vmem_limit = None if vmem_need <= (32 << 20) else int(vmem_need)

    out_flat = pl.pallas_call(
        _add_pos_kernel,
        out_shape=jax.ShapeDtypeStruct((B, t, hwd), x.dtype),
        grid_spec=pltpu.PrefetchScalarGridSpec(
            num_scalar_prefetch=0,
            grid=(B,),
            in_specs=[
                # pos: constant block index -> fetched once, kept resident.
                pl.BlockSpec((t, hwd), lambda b: (0, 0)),
                # x: one fat (t, hwd) slab per batch element.
                pl.BlockSpec((1, t, hwd), lambda b: (b, 0, 0)),
            ],
            out_specs=pl.BlockSpec((1, t, hwd), lambda b: (b, 0, 0)),
        ),
        compiler_params=pltpu.CompilerParams(
            dimension_semantics=("parallel",),
            vmem_limit_bytes=vmem_limit,
        ),
        # x is input index 1 (after pos); the op is x += pos, so alias it.
        input_output_aliases={1: 0},
        cost_estimate=pl.CostEstimate(
            flops=x.size,
            transcendentals=0,
            bytes_accessed=2 * x.size * itemsize + pos_flat.size * itemsize,
        ),
    )(pos_flat, x_flat)

    return out_flat.reshape(B, t, h, w, d)


def _reference(x, time_w, height_w, width_w):
    B, t, h, w, d = x.shape
    t_emb = time_w[:t]        # (t, nt)
    w_emb = width_w[:w]       # (w, nw)
    h_emb = height_w[:h]      # (h, nh)
    pos_t = jnp.broadcast_to(t_emb[:, None, None, :], (t, h, w, t_emb.shape[1]))
    pos_w = jnp.broadcast_to(w_emb[None, None, :, :], (t, h, w, w_emb.shape[1]))
    pos_h = jnp.broadcast_to(h_emb[None, :, None, :], (t, h, w, h_emb.shape[1]))
    pos = jnp.concatenate([pos_t, pos_w, pos_h], axis=-1)   # [time, width, height]
    return x + pos[None]


if __name__ == "__main__":
    # Module config (small): block_shape = (max_t, max_h, max_w), n_embd
    max_t, max_h, max_w = 8, 4, 4
    n_embd = 32
    n_dims = 3
    n_embd_t = n_embd_h = n_embd_w = n_embd // n_dims      # 10 each
    n_embd_t += n_embd % n_dims                            # time gets 12

    key = jax.random.PRNGKey(0)
    k_t, k_h, k_w, k_x = jax.random.split(key, 4)

    # nn.init.uniform_ -> U[0, 1)
    time_w = jax.random.uniform(k_t, (max_t, n_embd_t), dtype=jnp.float32)
    height_w = jax.random.uniform(k_h, (max_h, n_embd_h), dtype=jnp.float32)
    width_w = jax.random.uniform(k_w, (max_w, n_embd_w), dtype=jnp.float32)

    # input feature map (B, t, h, w, d)
    B, t, h, w = 2, 4, 4, 4
    x = jax.random.normal(k_x, (B, t, h, w, n_embd), dtype=jnp.float32)

    fwd = jax.jit(position_embedding_learned_visual)
    out = fwd(x, time_w, height_w, width_w)
    out = jax.block_until_ready(out)

    ref = _reference(x, time_w, height_w, width_w)
    assert out.shape == x.shape and out.dtype == x.dtype
    assert jnp.allclose(out, ref, atol=1e-6, rtol=1e-6), "mismatch vs reference"

    print("KERNEL_OK")
</pallas_src>

<mosaic_0001>
module attributes {stable_mosaic.version = 11 : i64} {
  func.func @_add_pos_kernel(%arg0: i32, %arg1: memref<4x512xf32, #tpu.memory_space<vmem>>, %arg2: memref<1x4x512xf32, #tpu.memory_space<vmem>>, %arg3: memref<1x4x512xf32, #tpu.memory_space<vmem>>) attributes {dimension_semantics = [#tpu.dimension_semantics<parallel>], iteration_bounds = array<i64: 2>, scalar_prefetch = 0 : i64, scratch_operands = 0 : i64, tpu.core_type = #tpu.core_type<tc>, window_params = [{pipeline_mode = #tpu.pipeline_mode<synchronous>, transform_indices = @transform_0, window_bounds = array<i64: 4, 512>}, {transform_indices = @transform_1, window_bounds = array<i64: 1, 4, 512>}, {transform_indices = @transform_2, window_bounds = array<i64: 1, 4, 512>}]} {
    %c0 = arith.constant 0 : index
    %c0_0 = arith.constant 0 : index
    %c0_1 = arith.constant 0 : index
    %0 = vector.load %arg2[%c0, %c0_0, %c0_1] : memref<1x4x512xf32, #tpu.memory_space<vmem>>, vector<1x4x512xf32>
    %1 = vector.shape_cast %0 : vector<1x4x512xf32> to vector<4x512xf32>
    %c0_2 = arith.constant 0 : index
    %c0_3 = arith.constant 0 : index
    %2 = vector.load %arg1[%c0_2, %c0_3] : memref<4x512xf32, #tpu.memory_space<vmem>>, vector<4x512xf32>
    %3 = arith.addf %1, %2 : vector<4x512xf32>
    %c0_4 = arith.constant 0 : index
    %c0_5 = arith.constant 0 : index
    %c0_6 = arith.constant 0 : index
    %4 = vector.load %arg3[%c0_4, %c0_5, %c0_6] : memref<1x4x512xf32, #tpu.memory_space<vmem>>, vector<1x4x512xf32>
    %5 = vector.shape_cast %4 : vector<1x4x512xf32> to vector<4x512xf32>
    %6 = vector.shape_cast %3 : vector<4x512xf32> to vector<1x4x512xf32>
    tpu.vector_store %arg3[%c0_4, %c0_5, %c0_6], %6 {strides = array<i32>} : memref<1x4x512xf32, #tpu.memory_space<vmem>>, vector<1x4x512xf32>,
    return
  }
  func.func @transform_0(%arg0: i32) -> (i32, i32) {
    %c0_i32 = arith.constant 0 : i32
    %c0_i32_0 = arith.constant 0 : i32
    %c0_i32_1 = arith.constant 0 : i32
    return %c0_i32, %c0_i32_0 : i32, i32
  }
  func.func @transform_1(%arg0: i32) -> (i32, i32, i32) {
    %c0_i32 = arith.constant 0 : i32
    %c0_i32_0 = arith.constant 0 : i32
    %c0_i32_1 = arith.constant 0 : i32
    return %arg0, %c0_i32, %c0_i32_0 : i32, i32, i32
  }
  func.func @transform_2(%arg0: i32) -> (i32, i32, i32) {
    %c0_i32 = arith.constant 0 : i32
    %c0_i32_0 = arith.constant 0 : i32
    %c0_i32_1 = arith.constant 0 : i32
    return %arg0, %c0_i32, %c0_i32_0 : i32, i32, i32
  }
}

</mosaic_0001>

<bundles_post_ra>
// kernel: position_embedding_learned_visual.1
= control target key start
LH: loop header
LB: loop body
LE: loop exit
PB: predicated region body
PF: predicated region fallthrough
CT: control target
= control target key end

     0   :  { %s232_s9 = smov 0   ;;  %s263_s0 = inlined_call_operand.vmem [shape: f32[4,512], index: 0, kind: input, shape index: {}]   ;;  %s264_s1 = inlined_call_operand.vmem [shape: f32[2,4,512], index: 1, kind: input, shape index: {}, may-alias: {1,2}]   ;;  %s265_s2 = inlined_call_operand.vmem [shape: f32[2,4,512], index: 2, kind: output, shape index: {}, may-alias: {1,2}]  }
   0x1 LB: > { %s207_s10 = sadd.s32 4294967295, %s234_s9   ;;  %p211_p0 = scmp.ge.s32.totalorder %s234_s9, 1  ;;  %s234_s9 = sphi %s232_s9, %s12_s9  }
   0x2   : > { %p112_p1 = scmp.lt.s32.totalorder %s234_s9, 3 }
   0x4   : > { %p113_p2 = pnand %p211_p0, %p112_p1 }
   0x5   : > { %p134_p3 = scmp.lt.s32.totalorder (!%p113_p2), %s207_s10, 1 }
   0x6   : > { %116 = sbr.rel (%p113_p2) target bundleno = 19 (0x13), region = 28 }
   0xb   : > { %s267_s10 = smov (!%p134_p3, %s207_s10), 1  ;;  %v146_v0 = vld [vmem:[%s263_s0] sm:$0xff]  ;;  %v147_v1 = vld [vmem:[%s263_s0 + $0x8] sm:$0xff] }
   0xc   : > { %s218_s11 = sshll.u32 %s267_s10, 4 }
   0xd   : > { %s138_s18 = scalar_lea.vmem %s264_s1, %s218_s11  ;;  %s143_s21 = scalar_lea.vmem %s265_s2, %s218_s11 }
   0xe   : > { %v144_v2 = vld [vmem:[%s138_s18] sm:$0xff]  ;;  %v145_v3 = vld [vmem:[%s138_s18 + $0x8] sm:$0xff] }
   0xf   : > { %v148_v4 = vadd.f32 %v146_v0, %v144_v2  ;;  %v149_v5 = vadd.f32 %v147_v1, %v145_v3 }
  0x11   : > { %150 = vst [vmem:[%s143_s21] sm:$0xff] %v148_v4 }
  0x12   : > { %151 = vst [vmem:[%s143_s21 + $0x8] sm:$0xff] %v149_v5 }
  0x13 PF: > { %s12_s9 = sadd.s32 1, %s234_s9  }
  0x14   : > { %p9_p4 = scmp.ge.s32.totalorder %s12_s9, 4  }
  0x16   :  { %11 = sbr.rel (!%p9_p4) target bundleno = 1 (0x1), region = 58 }

</bundles_post_ra>
